<compile_context>
chip_gen: v7x
topology: tpu7x:2x2x1
jax: 0.10.0
libtpu: 0.0.40
codegen_flags: <defaults>
</compile_context>

<pallas_src>
import jax
import jax.numpy as jnp
from jax.experimental import pallas as pl
from jax.experimental.pallas import tpu as pltpu

# ------------------------- configuration (small, deterministic) -------------------------
N, C_IN, H, W = 2, 4, 16, 16
C_OUT = 8
KH = KW = 3
STRIDE = 1
PAD = 1
DILATION = 1
EPS = 1e-5

# TODO(synk): the in-kernel tap-slicing path assumes STRIDE == 1 (this module instance's
#             config).  General stride needs the slab-assembly im2col variant instead.
assert STRIDE == 1

HP, WP = H + 2 * PAD, W + 2 * PAD                           # padded spatial (18, 18)
H_OUT = (HP - DILATION * (KH - 1) - 1) // STRIDE + 1        # 16
W_OUT = (WP - DILATION * (KW - 1) - 1) // STRIDE + 1        # 16
TAPS = KH * KW                                              # 9
EMB = H_OUT * WP                                            # 288: embedded output width/image
MAX_OFF = (KH - 1) * DILATION * WP + (KW - 1) * DILATION    # 38: largest tap lane offset
P_FLAT = ((max(HP * WP, MAX_OFF + EMB) + 127) // 128) * 128  # 384: zero-padded flat lane len


# ------------------------------------ Pallas kernel -------------------------------------
def basic_conv2d_kernel(x_ref, w_ref, bias_ref, o_ref):
    """Single grid step.

    x_ref    : (N, C_IN, P_FLAT)    padded activation, (HP*WP) flattened onto lanes and
                                    zero-padded to P_FLAT (so every tap slice is in bounds)
    w_ref    : (TAPS, C_OUT, C_IN)  BN-scale-folded conv weight, one (C_OUT, C_IN) slab
                                    per (kh, kw) tap
    bias_ref : (C_OUT, 1)           folded BN bias  beta - mean * scale
    o_ref    : (N, C_OUT, EMB)      embedded-layout output (each of H_OUT rows spans WP
                                    lanes; the last WP - W_OUT lanes per row are don't-care)
    """
    for n in range(N):                       # static, tiny; batch folded into one grid step
        acc = jnp.zeros((C_OUT, EMB), jnp.float32)
        for kh in range(KH):
            for kw in range(KW):
                # In-kernel "im2col": with stride 1, output column p and input column
                # p + off line up, so each tap is a static-offset lane slice (stays in VMEM).
                off = kh * DILATION * WP + kw * DILATION
                tap = x_ref[n, :, pl.ds(off, EMB)]          # (C_IN, EMB)
                # Accumulating MXU matmuls, f32 accumulation.  At this toy shape this is a
                # single-vmatmul-latency problem, not throughput (review: don't pad C_OUT/K
                # for MXU fill); at real sizes (C_OUT>=64, K>=128) assemble a (K, M_tile)
                # slab in VMEM scratch and issue fewer, deeper matmuls.
                acc += jnp.dot(w_ref[kh * KW + kw], tap,
                               preferred_element_type=jnp.float32)
        # Fused BatchNorm bias (scale already folded into the weights) + ReLU, all f32.
        y = jnp.maximum(acc + bias_ref[...], 0.0)
        # Lane-dense store: 288 lanes per row (2 unmasked vst + short tail), no cross-lane
        # shuffle, and no wrapper-side transpose needed afterwards.
        o_ref[n] = y.astype(o_ref.dtype)


# ---------------------------------- wrapper (layout glue) -------------------------------
def basic_conv2d(x_nchw, weight_oihw, gamma, beta, running_mean, running_var):
    """x_nchw: (N, C_IN, H, W) f32 -> (N, C_OUT, H_OUT, W_OUT) f32.

    BatchNorm uses eval-mode running statistics (standard for a fused inference kernel).
    TODO(synk): training-mode batch statistics are not implemented.
    """
    x = x_nchw.astype(jnp.float32)

    # Pad spatially, flatten (HP, WP) onto the lane axis, zero-pad the flat axis to P_FLAT.
    # One tiny fusion (~12 KiB materialized); no im2col slab and no major-dim transpose hits
    # HBM (review item 1).
    x_pad = jnp.pad(x, ((0, 0), (0, 0), (PAD, PAD), (PAD, PAD)))        # (N, C_IN, HP, WP)
    x_flat = x_pad.reshape(N, C_IN, HP * WP)                            # contiguous reshape
    x_flat = jnp.pad(x_flat, ((0, 0), (0, 0), (0, P_FLAT - HP * WP)))   # (N, C_IN, P_FLAT)

    # Fold BN (eval-mode) scale into the conv weight (removes the per-vreg scale multiply
    # and one tiny padded VMEM input + DMA); only the bias goes to the kernel.  O(C_OUT*K)
    # work that fuses into the weight-prep fusion.
    scale = (gamma / jnp.sqrt(running_var + EPS)).astype(jnp.float32)   # (C_OUT,)
    bias = (beta - running_mean * scale).astype(jnp.float32).reshape(C_OUT, 1)
    w = weight_oihw.astype(jnp.float32) * scale[:, None, None, None]    # (C_OUT, C_IN, KH, KW)
    w_taps = jnp.transpose(w, (2, 3, 0, 1)).reshape(TAPS, C_OUT, C_IN)  # (9, C_OUT, C_IN)
    # NOTE (v6e/v7x, real sizes): cast x_flat / w_taps to bf16 here and keep
    # preferred_element_type=f32 in the kernel's dot (halves activation DMA bytes, ~2x MXU
    # rate); kept f32 so the strict 1e-4-vs-f32 check holds and v5e's f32-only VPU is fine.

    out_emb = pl.pallas_call(
        basic_conv2d_kernel,
        out_shape=jax.ShapeDtypeStruct((N, C_OUT, EMB), jnp.float32),
        grid_spec=pltpu.PrefetchScalarGridSpec(
            num_scalar_prefetch=0,
            # One grid step: batch + spatial fit a single VMEM-resident block, so extra steps
            # are pure per-step overhead.  NOTE (real sizes): tile output rows / batch onto a
            # leading "parallel" grid axis (>=2 tiles for v7x's two TensorCores, >=4 steps to
            # hide DMA), size each activation tile against v7x's 64 MiB VMEM (x2 for
            # double-buffering, raise vmem_limit_bytes with headroom if needed) and
            # accumulate any K tiling on a trailing "arbitrary" axis with pl.when init/final.
            grid=(1,),
            in_specs=[
                pl.BlockSpec((N, C_IN, P_FLAT), lambda i: (0, 0, 0)),
                pl.BlockSpec((TAPS, C_OUT, C_IN), lambda i: (0, 0, 0)),
                pl.BlockSpec((C_OUT, 1), lambda i: (0, 0)),
            ],
            out_specs=pl.BlockSpec((N, C_OUT, EMB), lambda i: (0, 0, 0)),
        ),
        compiler_params=pltpu.CompilerParams(dimension_semantics=("arbitrary",)),
    )(x_flat, w_taps, bias)

    # Embedded layout -> NCHW: contiguous reshape + cheap interior slice (no HBM transpose).
    return out_emb.reshape(N, C_OUT, H_OUT, WP)[:, :, :, :W_OUT]


# ----------------------------------------- main -----------------------------------------
if __name__ == "__main__":
    key = jax.random.PRNGKey(0)
    k_x, k_w, k_g, k_b, k_m, k_v = jax.random.split(key, 6)

    x_nchw = jax.random.normal(k_x, (N, C_IN, H, W), dtype=jnp.float32)
    weight = jax.random.normal(k_w, (C_OUT, C_IN, KH, KW), dtype=jnp.float32) * 0.1
    gamma = 1.0 + 0.1 * jax.random.normal(k_g, (C_OUT,), dtype=jnp.float32)
    beta = 0.1 * jax.random.normal(k_b, (C_OUT,), dtype=jnp.float32)
    running_mean = 0.05 * jax.random.normal(k_m, (C_OUT,), dtype=jnp.float32)
    running_var = jnp.abs(1.0 + 0.1 * jax.random.normal(k_v, (C_OUT,), dtype=jnp.float32))

    y = basic_conv2d(x_nchw, weight, gamma, beta, running_mean, running_var)
    y = jax.block_until_ready(y)

    # Reference: lax.conv_general_dilated (torch Conv2d bias=False semantics) + BN + ReLU.
    ref_conv = jax.lax.conv_general_dilated(
        x_nchw, weight,
        window_strides=(STRIDE, STRIDE),
        padding=((PAD, PAD), (PAD, PAD)),
        rhs_dilation=(DILATION, DILATION),
        dimension_numbers=("NCHW", "OIHW", "NCHW"),
    )
    scale_ref = gamma / jnp.sqrt(running_var + EPS)
    bias_ref = beta - running_mean * scale_ref
    ref = jnp.maximum(
        ref_conv * scale_ref[None, :, None, None] + bias_ref[None, :, None, None], 0.0)

    assert y.shape == (N, C_OUT, H_OUT, W_OUT)
    assert jnp.allclose(y, ref, atol=1e-4, rtol=1e-4), float(jnp.max(jnp.abs(y - ref)))
    print("KERNEL_OK")
</pallas_src>

<mosaic_0001>
module attributes {stable_mosaic.version = 11 : i64} {
  func.func @basic_conv2d_kernel(%arg0: i32, %arg1: memref<2x4x384xf32, #tpu.memory_space<vmem>>, %arg2: memref<9x8x4xf32, #tpu.memory_space<vmem>>, %arg3: memref<8x1xf32, #tpu.memory_space<vmem>>, %arg4: memref<2x8x288xf32, #tpu.memory_space<vmem>>) attributes {dimension_semantics = [#tpu.dimension_semantics<arbitrary>], iteration_bounds = array<i64: 1>, scalar_prefetch = 0 : i64, scratch_operands = 0 : i64, tpu.core_type = #tpu.core_type<tc>, window_params = [{pipeline_mode = #tpu.pipeline_mode<synchronous>, transform_indices = @transform_0, window_bounds = array<i64: 2, 4, 384>}, {pipeline_mode = #tpu.pipeline_mode<synchronous>, transform_indices = @transform_1, window_bounds = array<i64: 9, 8, 4>}, {pipeline_mode = #tpu.pipeline_mode<synchronous>, transform_indices = @transform_2, window_bounds = array<i64: 8, 1>}, {pipeline_mode = #tpu.pipeline_mode<synchronous>, transform_indices = @transform_3, window_bounds = array<i64: 2, 8, 288>}]} {
    %cst = arith.constant 0.000000e+00 : f32
    %0 = vector.broadcast %cst : f32 to vector<8x288xf32>
    %c0 = arith.constant 0 : index
    %c0_0 = arith.constant 0 : index
    %c0_1 = arith.constant 0 : index
    %1 = vector.load %arg1[%c0, %c0_0, %c0_1] : memref<2x4x384xf32, #tpu.memory_space<vmem>>, vector<1x4x288xf32>
    %2 = vector.shape_cast %1 : vector<1x4x288xf32> to vector<4x288xf32>
    %c0_2 = arith.constant 0 : index
    %c0_3 = arith.constant 0 : index
    %c0_4 = arith.constant 0 : index
    %3 = vector.load %arg2[%c0_2, %c0_3, %c0_4] : memref<9x8x4xf32, #tpu.memory_space<vmem>>, vector<1x8x4xf32>
    %4 = vector.shape_cast %3 : vector<1x8x4xf32> to vector<8x4xf32>
    %cst_5 = arith.constant dense<0.000000e+00> : vector<8x288xf32>
    %5 = tpu.matmul %4, %2, %cst_5 {dimension_numbers = #tpu.dot_dimension_numbers<[1], [0], [0], [1], [0, 0, 1, 1], [], []>} : vector<8x4xf32>, vector<4x288xf32>, vector<8x288xf32> -> vector<8x288xf32>
    %6 = arith.addf %0, %5 : vector<8x288xf32>
    %c0_6 = arith.constant 0 : index
    %c0_7 = arith.constant 0 : index
    %c1 = arith.constant 1 : index
    %7 = vector.load %arg1[%c0_6, %c0_7, %c1] : memref<2x4x384xf32, #tpu.memory_space<vmem>>, vector<1x4x288xf32>
    %8 = vector.shape_cast %7 : vector<1x4x288xf32> to vector<4x288xf32>
    %c1_8 = arith.constant 1 : index
    %c0_9 = arith.constant 0 : index
    %c0_10 = arith.constant 0 : index
    %9 = vector.load %arg2[%c1_8, %c0_9, %c0_10] : memref<9x8x4xf32, #tpu.memory_space<vmem>>, vector<1x8x4xf32>
    %10 = vector.shape_cast %9 : vector<1x8x4xf32> to vector<8x4xf32>
    %cst_11 = arith.constant dense<0.000000e+00> : vector<8x288xf32>
    %11 = tpu.matmul %10, %8, %cst_11 {dimension_numbers = #tpu.dot_dimension_numbers<[1], [0], [0], [1], [0, 0, 1, 1], [], []>} : vector<8x4xf32>, vector<4x288xf32>, vector<8x288xf32> -> vector<8x288xf32>
    %12 = arith.addf %6, %11 : vector<8x288xf32>
    %c0_12 = arith.constant 0 : index
    %c0_13 = arith.constant 0 : index
    %c2 = arith.constant 2 : index
    %13 = vector.load %arg1[%c0_12, %c0_13, %c2] : memref<2x4x384xf32, #tpu.memory_space<vmem>>, vector<1x4x288xf32>
    %14 = vector.shape_cast %13 : vector<1x4x288xf32> to vector<4x288xf32>
    %c2_14 = arith.constant 2 : index
    %c0_15 = arith.constant 0 : index
    %c0_16 = arith.constant 0 : index
    %15 = vector.load %arg2[%c2_14, %c0_15, %c0_16] : memref<9x8x4xf32, #tpu.memory_space<vmem>>, vector<1x8x4xf32>
    %16 = vector.shape_cast %15 : vector<1x8x4xf32> to vector<8x4xf32>
    %cst_17 = arith.constant dense<0.000000e+00> : vector<8x288xf32>
    %17 = tpu.matmul %16, %14, %cst_17 {dimension_numbers = #tpu.dot_dimension_numbers<[1], [0], [0], [1], [0, 0, 1, 1], [], []>} : vector<8x4xf32>, vector<4x288xf32>, vector<8x288xf32> -> vector<8x288xf32>
    %18 = arith.addf %12, %17 : vector<8x288xf32>
    %c0_18 = arith.constant 0 : index
    %c0_19 = arith.constant 0 : index
    %c18 = arith.constant 18 : index
    %19 = vector.load %arg1[%c0_18, %c0_19, %c18] : memref<2x4x384xf32, #tpu.memory_space<vmem>>, vector<1x4x288xf32>
    %20 = vector.shape_cast %19 : vector<1x4x288xf32> to vector<4x288xf32>
    %c3 = arith.constant 3 : index
    %c0_20 = arith.constant 0 : index
    %c0_21 = arith.constant 0 : index
    %21 = vector.load %arg2[%c3, %c0_20, %c0_21] : memref<9x8x4xf32, #tpu.memory_space<vmem>>, vector<1x8x4xf32>
    %22 = vector.shape_cast %21 : vector<1x8x4xf32> to vector<8x4xf32>
    %cst_22 = arith.constant dense<0.000000e+00> : vector<8x288xf32>
    %23 = tpu.matmul %22, %20, %cst_22 {dimension_numbers = #tpu.dot_dimension_numbers<[1], [0], [0], [1], [0, 0, 1, 1], [], []>} : vector<8x4xf32>, vector<4x288xf32>, vector<8x288xf32> -> vector<8x288xf32>
    %24 = arith.addf %18, %23 : vector<8x288xf32>
    %c0_23 = arith.constant 0 : index
    %c0_24 = arith.constant 0 : index
    %c19 = arith.constant 19 : index
    %25 = vector.load %arg1[%c0_23, %c0_24, %c19] : memref<2x4x384xf32, #tpu.memory_space<vmem>>, vector<1x4x288xf32>
    %26 = vector.shape_cast %25 : vector<1x4x288xf32> to vector<4x288xf32>
    %c4 = arith.constant 4 : index
    %c0_25 = arith.constant 0 : index
    %c0_26 = arith.constant 0 : index
    %27 = vector.load %arg2[%c4, %c0_25, %c0_26] : memref<9x8x4xf32, #tpu.memory_space<vmem>>, vector<1x8x4xf32>
    %28 = vector.shape_cast %27 : vector<1x8x4xf32> to vector<8x4xf32>
    %cst_27 = arith.constant dense<0.000000e+00> : vector<8x288xf32>
    %29 = tpu.matmul %28, %26, %cst_27 {dimension_numbers = #tpu.dot_dimension_numbers<[1], [0], [0], [1], [0, 0, 1, 1], [], []>} : vector<8x4xf32>, vector<4x288xf32>, vector<8x288xf32> -> vector<8x288xf32>
    %30 = arith.addf %24, %29 : vector<8x288xf32>
    %c0_28 = arith.constant 0 : index
    %c0_29 = arith.constant 0 : index
    %c20 = arith.constant 20 : index
    %31 = vector.load %arg1[%c0_28, %c0_29, %c20] : memref<2x4x384xf32, #tpu.memory_space<vmem>>, vector<1x4x288xf32>
    %32 = vector.shape_cast %31 : vector<1x4x288xf32> to vector<4x288xf32>
    %c5 = arith.constant 5 : index
    %c0_30 = arith.constant 0 : index
    %c0_31 = arith.constant 0 : index
    %33 = vector.load %arg2[%c5, %c0_30, %c0_31] : memref<9x8x4xf32, #tpu.memory_space<vmem>>, vector<1x8x4xf32>
    %34 = vector.shape_cast %33 : vector<1x8x4xf32> to vector<8x4xf32>
    %cst_32 = arith.constant dense<0.000000e+00> : vector<8x288xf32>
    %35 = tpu.matmul %34, %32, %cst_32 {dimension_numbers = #tpu.dot_dimension_numbers<[1], [0], [0], [1], [0, 0, 1, 1], [], []>} : vector<8x4xf32>, vector<4x288xf32>, vector<8x288xf32> -> vector<8x288xf32>
    %36 = arith.addf %30, %35 : vector<8x288xf32>
    %c0_33 = arith.constant 0 : index
    %c0_34 = arith.constant 0 : index
    %c36 = arith.constant 36 : index
    %37 = vector.load %arg1[%c0_33, %c0_34, %c36] : memref<2x4x384xf32, #tpu.memory_space<vmem>>, vector<1x4x288xf32>
    %38 = vector.shape_cast %37 : vector<1x4x288xf32> to vector<4x288xf32>
    %c6 = arith.constant 6 : index
    %c0_35 = arith.constant 0 : index
    %c0_36 = arith.constant 0 : index
    %39 = vector.load %arg2[%c6, %c0_35, %c0_36] : memref<9x8x4xf32, #tpu.memory_space<vmem>>, vector<1x8x4xf32>
    %40 = vector.shape_cast %39 : vector<1x8x4xf32> to vector<8x4xf32>
    %cst_37 = arith.constant dense<0.000000e+00> : vector<8x288xf32>
    %41 = tpu.matmul %40, %38, %cst_37 {dimension_numbers = #tpu.dot_dimension_numbers<[1], [0], [0], [1], [0, 0, 1, 1], [], []>} : vector<8x4xf32>, vector<4x288xf32>, vector<8x288xf32> -> vector<8x288xf32>
    %42 = arith.addf %36, %41 : vector<8x288xf32>
    %c0_38 = arith.constant 0 : index
    %c0_39 = arith.constant 0 : index
    %c37 = arith.constant 37 : index
    %43 = vector.load %arg1[%c0_38, %c0_39, %c37] : memref<2x4x384xf32, #tpu.memory_space<vmem>>, vector<1x4x288xf32>
    %44 = vector.shape_cast %43 : vector<1x4x288xf32> to vector<4x288xf32>
    %c7 = arith.constant 7 : index
    %c0_40 = arith.constant 0 : index
    %c0_41 = arith.constant 0 : index
    %45 = vector.load %arg2[%c7, %c0_40, %c0_41] : memref<9x8x4xf32, #tpu.memory_space<vmem>>, vector<1x8x4xf32>
    %46 = vector.shape_cast %45 : vector<1x8x4xf32> to vector<8x4xf32>
    %cst_42 = arith.constant dense<0.000000e+00> : vector<8x288xf32>
    %47 = tpu.matmul %46, %44, %cst_42 {dimension_numbers = #tpu.dot_dimension_numbers<[1], [0], [0], [1], [0, 0, 1, 1], [], []>} : vector<8x4xf32>, vector<4x288xf32>, vector<8x288xf32> -> vector<8x288xf32>
    %48 = arith.addf %42, %47 : vector<8x288xf32>
    %c0_43 = arith.constant 0 : index
    %c0_44 = arith.constant 0 : index
    %c38 = arith.constant 38 : index
    %49 = vector.load %arg1[%c0_43, %c0_44, %c38] : memref<2x4x384xf32, #tpu.memory_space<vmem>>, vector<1x4x288xf32>
    %50 = vector.shape_cast %49 : vector<1x4x288xf32> to vector<4x288xf32>
    %c8 = arith.constant 8 : index
    %c0_45 = arith.constant 0 : index
    %c0_46 = arith.constant 0 : index
    %51 = vector.load %arg2[%c8, %c0_45, %c0_46] : memref<9x8x4xf32, #tpu.memory_space<vmem>>, vector<1x8x4xf32>
    %52 = vector.shape_cast %51 : vector<1x8x4xf32> to vector<8x4xf32>
    %cst_47 = arith.constant dense<0.000000e+00> : vector<8x288xf32>
    %53 = tpu.matmul %52, %50, %cst_47 {dimension_numbers = #tpu.dot_dimension_numbers<[1], [0], [0], [1], [0, 0, 1, 1], [], []>} : vector<8x4xf32>, vector<4x288xf32>, vector<8x288xf32> -> vector<8x288xf32>
    %54 = arith.addf %48, %53 : vector<8x288xf32>
    %c0_48 = arith.constant 0 : index
    %c0_49 = arith.constant 0 : index
    %55 = vector.load %arg3[%c0_48, %c0_49] : memref<8x1xf32, #tpu.memory_space<vmem>>, vector<8x1xf32>
    %56 = vector.broadcast %55 : vector<8x1xf32> to vector<8x288xf32>
    %57 = arith.addf %54, %56 : vector<8x288xf32>
    %cst_50 = arith.constant 0.000000e+00 : f32
    %58 = vector.broadcast %cst_50 : f32 to vector<8x288xf32>
    %59 = arith.maximumf %57, %58 : vector<8x288xf32>
    %c0_51 = arith.constant 0 : index
    %c0_52 = arith.constant 0 : index
    %c0_53 = arith.constant 0 : index
    %60 = vector.load %arg4[%c0_51, %c0_52, %c0_53] : memref<2x8x288xf32, #tpu.memory_space<vmem>>, vector<1x8x288xf32>
    %61 = vector.shape_cast %60 : vector<1x8x288xf32> to vector<8x288xf32>
    %62 = vector.shape_cast %59 : vector<8x288xf32> to vector<1x8x288xf32>
    tpu.vector_store %arg4[%c0_51, %c0_52, %c0_53], %62 {strides = array<i32>} : memref<2x8x288xf32, #tpu.memory_space<vmem>>, vector<1x8x288xf32>,
    %cst_54 = arith.constant 0.000000e+00 : f32
    %63 = vector.broadcast %cst_54 : f32 to vector<8x288xf32>
    %c1_55 = arith.constant 1 : index
    %c0_56 = arith.constant 0 : index
    %c0_57 = arith.constant 0 : index
    %64 = vector.load %arg1[%c1_55, %c0_56, %c0_57] : memref<2x4x384xf32, #tpu.memory_space<vmem>>, vector<1x4x288xf32>
    %65 = vector.shape_cast %64 : vector<1x4x288xf32> to vector<4x288xf32>
    %c0_58 = arith.constant 0 : index
    %c0_59 = arith.constant 0 : index
    %c0_60 = arith.constant 0 : index
    %66 = vector.load %arg2[%c0_58, %c0_59, %c0_60] : memref<9x8x4xf32, #tpu.memory_space<vmem>>, vector<1x8x4xf32>
    %67 = vector.shape_cast %66 : vector<1x8x4xf32> to vector<8x4xf32>
    %cst_61 = arith.constant dense<0.000000e+00> : vector<8x288xf32>
    %68 = tpu.matmul %67, %65, %cst_61 {dimension_numbers = #tpu.dot_dimension_numbers<[1], [0], [0], [1], [0, 0, 1, 1], [], []>} : vector<8x4xf32>, vector<4x288xf32>, vector<8x288xf32> -> vector<8x288xf32>
    %69 = arith.addf %63, %68 : vector<8x288xf32>
    %c1_62 = arith.constant 1 : index
    %c0_63 = arith.constant 0 : index
    %c1_64 = arith.constant 1 : index
    %70 = vector.load %arg1[%c1_62, %c0_63, %c1_64] : memref<2x4x384xf32, #tpu.memory_space<vmem>>, vector<1x4x288xf32>
    %71 = vector.shape_cast %70 : vector<1x4x288xf32> to vector<4x288xf32>
    %c1_65 = arith.constant 1 : index
    %c0_66 = arith.constant 0 : index
    %c0_67 = arith.constant 0 : index
    %72 = vector.load %arg2[%c1_65, %c0_66, %c0_67] : memref<9x8x4xf32, #tpu.memory_space<vmem>>, vector<1x8x4xf32>
    %73 = vector.shape_cast %72 : vector<1x8x4xf32> to vector<8x4xf32>
    %cst_68 = arith.constant dense<0.000000e+00> : vector<8x288xf32>
    %74 = tpu.matmul %73, %71, %cst_68 {dimension_numbers = #tpu.dot_dimension_numbers<[1], [0], [0], [1], [0, 0, 1, 1], [], []>} : vector<8x4xf32>, vector<4x288xf32>, vector<8x288xf32> -> vector<8x288xf32>
    %75 = arith.addf %69, %74 : vector<8x288xf32>
    %c1_69 = arith.constant 1 : index
    %c0_70 = arith.constant 0 : index
    %c2_71 = arith.constant 2 : index
    %76 = vector.load %arg1[%c1_69, %c0_70, %c2_71] : memref<2x4x384xf32, #tpu.memory_space<vmem>>, vector<1x4x288xf32>
    %77 = vector.shape_cast %76 : vector<1x4x288xf32> to vector<4x288xf32>
    %c2_72 = arith.constant 2 : index
    %c0_73 = arith.constant 0 : index
    %c0_74 = arith.constant 0 : index
    %78 = vector.load %arg2[%c2_72, %c0_73, %c0_74] : memref<9x8x4xf32, #tpu.memory_space<vmem>>, vector<1x8x4xf32>
    %79 = vector.shape_cast %78 : vector<1x8x4xf32> to vector<8x4xf32>
    %cst_75 = arith.constant dense<0.000000e+00> : vector<8x288xf32>
    %80 = tpu.matmul %79, %77, %cst_75 {dimension_numbers = #tpu.dot_dimension_numbers<[1], [0], [0], [1], [0, 0, 1, 1], [], []>} : vector<8x4xf32>, vector<4x288xf32>, vector<8x288xf32> -> vector<8x288xf32>
    %81 = arith.addf %75, %80 : vector<8x288xf32>
    %c1_76 = arith.constant 1 : index
    %c0_77 = arith.constant 0 : index
    %c18_78 = arith.constant 18 : index
    %82 = vector.load %arg1[%c1_76, %c0_77, %c18_78] : memref<2x4x384xf32, #tpu.memory_space<vmem>>, vector<1x4x288xf32>
    %83 = vector.shape_cast %82 : vector<1x4x288xf32> to vector<4x288xf32>
    %c3_79 = arith.constant 3 : index
    %c0_80 = arith.constant 0 : index
    %c0_81 = arith.constant 0 : index
    %84 = vector.load %arg2[%c3_79, %c0_80, %c0_81] : memref<9x8x4xf32, #tpu.memory_space<vmem>>, vector<1x8x4xf32>
    %85 = vector.shape_cast %84 : vector<1x8x4xf32> to vector<8x4xf32>
    %cst_82 = arith.constant dense<0.000000e+00> : vector<8x288xf32>
    %86 = tpu.matmul %85, %83, %cst_82 {dimension_numbers = #tpu.dot_dimension_numbers<[1], [0], [0], [1], [0, 0, 1, 1], [], []>} : vector<8x4xf32>, vector<4x288xf32>, vector<8x288xf32> -> vector<8x288xf32>
    %87 = arith.addf %81, %86 : vector<8x288xf32>
    %c1_83 = arith.constant 1 : index
    %c0_84 = arith.constant 0 : index
    %c19_85 = arith.constant 19 : index
    %88 = vector.load %arg1[%c1_83, %c0_84, %c19_85] : memref<2x4x384xf32, #tpu.memory_space<vmem>>, vector<1x4x288xf32>
    %89 = vector.shape_cast %88 : vector<1x4x288xf32> to vector<4x288xf32>
    %c4_86 = arith.constant 4 : index
    %c0_87 = arith.constant 0 : index
    %c0_88 = arith.constant 0 : index
    %90 = vector.load %arg2[%c4_86, %c0_87, %c0_88] : memref<9x8x4xf32, #tpu.memory_space<vmem>>, vector<1x8x4xf32>
    %91 = vector.shape_cast %90 : vector<1x8x4xf32> to vector<8x4xf32>
    %cst_89 = arith.constant dense<0.000000e+00> : vector<8x288xf32>
    %92 = tpu.matmul %91, %89, %cst_89 {dimension_numbers = #tpu.dot_dimension_numbers<[1], [0], [0], [1], [0, 0, 1, 1], [], []>} : vector<8x4xf32>, vector<4x288xf32>, vector<8x288xf32> -> vector<8x288xf32>
    %93 = arith.addf %87, %92 : vector<8x288xf32>
    %c1_90 = arith.constant 1 : index
    %c0_91 = arith.constant 0 : index
    %c20_92 = arith.constant 20 : index
    %94 = vector.load %arg1[%c1_90, %c0_91, %c20_92] : memref<2x4x384xf32, #tpu.memory_space<vmem>>, vector<1x4x288xf32>
    %95 = vector.shape_cast %94 : vector<1x4x288xf32> to vector<4x288xf32>
    %c5_93 = arith.constant 5 : index
    %c0_94 = arith.constant 0 : index
    %c0_95 = arith.constant 0 : index
    %96 = vector.load %arg2[%c5_93, %c0_94, %c0_95] : memref<9x8x4xf32, #tpu.memory_space<vmem>>, vector<1x8x4xf32>
    %97 = vector.shape_cast %96 : vector<1x8x4xf32> to vector<8x4xf32>
    %cst_96 = arith.constant dense<0.000000e+00> : vector<8x288xf32>
    %98 = tpu.matmul %97, %95, %cst_96 {dimension_numbers = #tpu.dot_dimension_numbers<[1], [0], [0], [1], [0, 0, 1, 1], [], []>} : vector<8x4xf32>, vector<4x288xf32>, vector<8x288xf32> -> vector<8x288xf32>
    %99 = arith.addf %93, %98 : vector<8x288xf32>
    %c1_97 = arith.constant 1 : index
    %c0_98 = arith.constant 0 : index
    %c36_99 = arith.constant 36 : index
    %100 = vector.load %arg1[%c1_97, %c0_98, %c36_99] : memref<2x4x384xf32, #tpu.memory_space<vmem>>, vector<1x4x288xf32>
    %101 = vector.shape_cast %100 : vector<1x4x288xf32> to vector<4x288xf32>
    %c6_100 = arith.constant 6 : index
    %c0_101 = arith.constant 0 : index
    %c0_102 = arith.constant 0 : index
    %102 = vector.load %arg2[%c6_100, %c0_101, %c0_102] : memref<9x8x4xf32, #tpu.memory_space<vmem>>, vector<1x8x4xf32>
    %103 = vector.shape_cast %102 : vector<1x8x4xf32> to vector<8x4xf32>
    %cst_103 = arith.constant dense<0.000000e+00> : vector<8x288xf32>
    %104 = tpu.matmul %103, %101, %cst_103 {dimension_numbers = #tpu.dot_dimension_numbers<[1], [0], [0], [1], [0, 0, 1, 1], [], []>} : vector<8x4xf32>, vector<4x288xf32>, vector<8x288xf32> -> vector<8x288xf32>
    %105 = arith.addf %99, %104 : vector<8x288xf32>
    %c1_104 = arith.constant 1 : index
    %c0_105 = arith.constant 0 : index
    %c37_106 = arith.constant 37 : index
    %106 = vector.load %arg1[%c1_104, %c0_105, %c37_106] : memref<2x4x384xf32, #tpu.memory_space<vmem>>, vector<1x4x288xf32>
    %107 = vector.shape_cast %106 : vector<1x4x288xf32> to vector<4x288xf32>
    %c7_107 = arith.constant 7 : index
    %c0_108 = arith.constant 0 : index
    %c0_109 = arith.constant 0 : index
    %108 = vector.load %arg2[%c7_107, %c0_108, %c0_109] : memref<9x8x4xf32, #tpu.memory_space<vmem>>, vector<1x8x4xf32>
    %109 = vector.shape_cast %108 : vector<1x8x4xf32> to vector<8x4xf32>
    %cst_110 = arith.constant dense<0.000000e+00> : vector<8x288xf32>
    %110 = tpu.matmul %109, %107, %cst_110 {dimension_numbers = #tpu.dot_dimension_numbers<[1], [0], [0], [1], [0, 0, 1, 1], [], []>} : vector<8x4xf32>, vector<4x288xf32>, vector<8x288xf32> -> vector<8x288xf32>
    %111 = arith.addf %105, %110 : vector<8x288xf32>
    %c1_111 = arith.constant 1 : index
    %c0_112 = arith.constant 0 : index
    %c38_113 = arith.constant 38 : index
    %112 = vector.load %arg1[%c1_111, %c0_112, %c38_113] : memref<2x4x384xf32, #tpu.memory_space<vmem>>, vector<1x4x288xf32>
    %113 = vector.shape_cast %112 : vector<1x4x288xf32> to vector<4x288xf32>
    %c8_114 = arith.constant 8 : index
    %c0_115 = arith.constant 0 : index
    %c0_116 = arith.constant 0 : index
    %114 = vector.load %arg2[%c8_114, %c0_115, %c0_116] : memref<9x8x4xf32, #tpu.memory_space<vmem>>, vector<1x8x4xf32>
    %115 = vector.shape_cast %114 : vector<1x8x4xf32> to vector<8x4xf32>
    %cst_117 = arith.constant dense<0.000000e+00> : vector<8x288xf32>
    %116 = tpu.matmul %115, %113, %cst_117 {dimension_numbers = #tpu.dot_dimension_numbers<[1], [0], [0], [1], [0, 0, 1, 1], [], []>} : vector<8x4xf32>, vector<4x288xf32>, vector<8x288xf32> -> vector<8x288xf32>
    %117 = arith.addf %111, %116 : vector<8x288xf32>
    %c0_118 = arith.constant 0 : index
    %c0_119 = arith.constant 0 : index
    %118 = vector.load %arg3[%c0_118, %c0_119] : memref<8x1xf32, #tpu.memory_space<vmem>>, vector<8x1xf32>
    %119 = vector.broadcast %118 : vector<8x1xf32> to vector<8x288xf32>
    %120 = arith.addf %117, %119 : vector<8x288xf32>
    %cst_120 = arith.constant 0.000000e+00 : f32
    %121 = vector.broadcast %cst_120 : f32 to vector<8x288xf32>
    %122 = arith.maximumf %120, %121 : vector<8x288xf32>
    %c1_121 = arith.constant 1 : index
    %c0_122 = arith.constant 0 : index
    %c0_123 = arith.constant 0 : index
    %123 = vector.load %arg4[%c1_121, %c0_122, %c0_123] : memref<2x8x288xf32, #tpu.memory_space<vmem>>, vector<1x8x288xf32>
    %124 = vector.shape_cast %123 : vector<1x8x288xf32> to vector<8x288xf32>
    %125 = vector.shape_cast %122 : vector<8x288xf32> to vector<1x8x288xf32>
    tpu.vector_store %arg4[%c1_121, %c0_122, %c0_123], %125 {strides = array<i32>} : memref<2x8x288xf32, #tpu.memory_space<vmem>>, vector<1x8x288xf32>,
    return
  }
  func.func @transform_0(%arg0: i32) -> (i32, i32, i32) {
    %c0_i32 = arith.constant 0 : i32
    %c0_i32_0 = arith.constant 0 : i32
    %c0_i32_1 = arith.constant 0 : i32
    %c0_i32_2 = arith.constant 0 : i32
    return %c0_i32, %c0_i32_0, %c0_i32_1 : i32, i32, i32
  }
  func.func @transform_1(%arg0: i32) -> (i32, i32, i32) {
    %c0_i32 = arith.constant 0 : i32
    %c0_i32_0 = arith.constant 0 : i32
    %c0_i32_1 = arith.constant 0 : i32
    %c0_i32_2 = arith.constant 0 : i32
    return %c0_i32, %c0_i32_0, %c0_i32_1 : i32, i32, i32
  }
  func.func @transform_2(%arg0: i32) -> (i32, i32) {
    %c0_i32 = arith.constant 0 : i32
    %c0_i32_0 = arith.constant 0 : i32
    %c0_i32_1 = arith.constant 0 : i32
    return %c0_i32, %c0_i32_0 : i32, i32
  }
  func.func @transform_3(%arg0: i32) -> (i32, i32, i32) {
    %c0_i32 = arith.constant 0 : i32
    %c0_i32_0 = arith.constant 0 : i32
    %c0_i32_1 = arith.constant 0 : i32
    %c0_i32_2 = arith.constant 0 : i32
    return %c0_i32, %c0_i32_0, %c0_i32_1 : i32, i32, i32
  }
}

</mosaic_0001>

<bundles_post_ra>
// kernel: tpu_custom_call.1
= control target key start
LH: loop header
LB: loop body
LE: loop exit
PB: predicated region body
PF: predicated region fallthrough
CT: control target
= control target key end

     0   :  { %s3372_s14 = smov 127   ;;  %s3373_s17 = smov 126   ;;  %v3374_v3 = vmov 0.0   ;;  %vm3375_vm0 = vmmov 0   ;;  %s3860_s0 = inlined_call_operand.vmem [shape: f32[2,4,384], index: 0, kind: input, shape index: {}]   ;;  %s3861_s1 = inlined_call_operand.vmem [shape: f32[9,8,4], index: 1, kind: input, shape index: {}]   ;;  %s3862_s2 = inlined_call_operand.vmem [shape: f32[8,1], index: 2, kind: input, shape index: {}]   ;;  %s3863_s3 = inlined_call_operand.hbm [shape: f32[2,8,288], index: 3, kind: output, shape index: {}]  }
   0x1   :  { %v3409_v0 = vld [vmem:[%s3860_s0] sm:$0xff]  ;;  %v3422_v2 = vld [vmem:[%s3860_s0 + $0x8] sm:$0xf]  ;;  %3208 = vmatprep.subr.mxu1 %v3374_v3  ;;  %107 = vmatprep.mubr.f32.mxu0 %v3374_v3 }
   0x2   :  { %23 = vrot.lane.b32.xlu1 %v3409_v0, %s3372_s14  ;;  %v3415_v1 = vcombine.high %v3409_v0, %v3409_v0  ;;  %v335_v4 = vld [vmem:[%s3860_s0 + $0x8] sm:$0xf]  ;;  %3210 = vmatprep.mubr.msk.f32.mxu1 %vm3375_vm0, %v3374_v3 }
   0x4   :  { %25 = vrot.lane.b32.xlu0 %v3415_v1, %s3372_s14 }
   0x6   :  { %343 = vrot.lane.b32.xlu1 %v3415_v1, %s3373_s17 }
   0x8   :  { %27 = vrot.lane.b32.xlu0 %v3422_v2, %s3372_s14 }
   0x9   :  { %8 = vsyncpa [#allocation3], 0  ;;  %v504_v5 = vld [vmem:[%s3860_s0 + $0x8] sm:$0xf]  ;;  %s3376_s22 = smov 110   ;;  %s3377_s23 = smov 109  }
   0xa   :  { %341 = vrot.lane.b32.xlu1 %v3409_v0, %s3373_s17  ;;  %v673_v6 = vld [vmem:[%s3860_s0 + $0x8] sm:$0xf]  ;;  %s3378_s28 = smov 108   ;;  %s3379_s29 = smov 92   ;;  %v3486_v11 = vld [vmem:[%s3860_s0 + $0xc] sm:$0xff]  ;;  %vm36_vm1 = vcmask 1043456  }
   0xb   :  { %v842_v7 = vld [vmem:[%s3860_s0 + $0x8] sm:$0xf]  ;;  %s3380_s7 = smov 91   ;;  %s3381_s8 = smov 90   ;;  %v3493_v12 = vld [vmem:[%s3860_s0 + $0x14] sm:$0xf]  ;;  %v3498_v13 = vcombine.high %v3486_v11, %v3486_v11 }
   0xc   :  { %345 = vrot.lane.b32.xlu0 %v335_v4, %s3373_s17  ;;  %v1011_v8 = vld [vmem:[%s3860_s0 + $0x8] sm:$0xf]  ;;  %v3117_v14 = vld [vmem:[%s3860_s0 + $0x14] sm:$0xf]  ;;  %vm29_vm2 = vcmask 1039360   ;;  %vm32_vm3 = vcmask 31744  }
   0xd   :  { %v1180_v9 = vld [vmem:[%s3860_s0 + $0x8] sm:$0xf]  ;;  %v3125_v15 = vld [vmem:[%s3860_s0 + $0x14] sm:$0xf]  ;;  %vm347_vm4 = vcmask 1031168   ;;  %v3592_v32 = vld [vmem:[%s3861_s1] sm:$0xff] }
   0xe   :  { %514 = vrot.lane.b32.xlu1 %v504_v5, %s3376_s22  ;;  %v1349_v10 = vld [vmem:[%s3860_s0 + $0x8] sm:$0xf]  ;;  %v3133_v16 = vld [vmem:[%s3860_s0 + $0x14] sm:$0xf]  ;;  %vm516_vm5 = vcmask 900096   ;;  %v1517_v34 = vld [vmem:[%s3862_s2] sm:$0xff] }
   0xf   :  { %v3141_v17 = vld [vmem:[%s3860_s0 + $0x14] sm:$0xf]  ;;  %v3567_v26 = vld [vmem:[%s3861_s1 + $0x8] sm:$0xff]  ;;  %v3382_v37 = vmov 0   ;;  %v3624_v42 = vld [vmem:[%s3861_s1 + $0x18] sm:$0xff]  ;;  %vm685_vm6 = vcmask 891904  }
  0x10   :  { %512 = vrot.lane.b32.xlu0 %v3415_v1, %s3376_s22  ;;  %v3149_v18 = vld [vmem:[%s3860_s0 + $0x14] sm:$0xf]  ;;  %3345 = vset.pattern.permute.xlu1 %v3382_v37  ;;  %v3637_v47 = vld [vmem:[%s3861_s1 + $0x20] sm:$0xff]  ;;  %v3653_v50 = vld [vmem:[%s3861_s1 + $0x28] sm:$0xff]  ;;  %vm854_vm7 = vcmask 883712   ;;  %vm1023_vm8 = vcmask 752640  }
  0x11   :  { %v3157_v19 = vld [vmem:[%s3860_s0 + $0x14] sm:$0xf]  ;;  %3344 = vset.pattern.permute.xlu0 %v3382_v37  ;;  %v3683_v61 = vld [vmem:[%s3861_s1 + $0x38] sm:$0xff]  ;;  %vm1192_vm9 = vcmask 744448   ;;  %vm1361_vm10 = vcmask 736256   ;;  %vm1531_vm11 = vcmask 261120  }
  0x12   :  { %681 = vrot.lane.b32.xlu1 %v3415_v1, %s3377_s23  ;;  %v3165_v20 = vld [vmem:[%s3860_s0 + $0x14] sm:$0xf] }
  0x13   :  { %v3608_v39 = vld [vmem:[%s3861_s1 + $0x10] sm:$0xff] }
  0x14   :  { %510 = vrot.lane.b32.xlu0 %v3409_v0, %s3376_s22  ;;  %v3670_v57 = vld [vmem:[%s3861_s1 + $0x30] sm:$0xff] }
  0x16   :  { %679 = vrot.lane.b32.xlu1 %v3409_v0, %s3377_s23 }
  0x18   :  { %683 = vrot.lane.b32.xlu0 %v673_v6, %s3377_s23 }
  0x1a   :  { %852 = vrot.lane.b32.xlu1 %v842_v7, %s3378_s28 }
  0x1c   :  { %850 = vrot.lane.b32.xlu0 %v3415_v1, %s3378_s28 }
  0x1e   :  { %1019 = vrot.lane.b32.xlu1 %v3415_v1, %s3379_s29 }
  0x20   :  { %848 = vrot.lane.b32.xlu0 %v3409_v0, %s3378_s28 }
  0x22   :  { %1017 = vrot.lane.b32.xlu1 %v3409_v0, %s3379_s29 }
  0x24   :  { %1021 = vrot.lane.b32.xlu0 %v1011_v8, %s3379_s29 }
  0x26   :  { %1190 = vrot.lane.b32.xlu1 %v1180_v9, %s3380_s7 }
  0x28   :  { %1188 = vrot.lane.b32.xlu0 %v3415_v1, %s3380_s7 }
  0x2a   :  { %1357 = vrot.lane.b32.xlu1 %v3415_v1, %s3381_s8 }
  0x2c   :  { %1186 = vrot.lane.b32.xlu0 %v3409_v0, %s3380_s7 }
  0x2e   :  { %1355 = vrot.lane.b32.xlu1 %v3409_v0, %s3381_s8 }
  0x30   :  { %1359 = vrot.lane.b32.xlu0 %v1349_v10, %s3381_s8 }
  0x32   :  { %1545 = vrot.lane.b32.xlu1 %v3493_v12, %s3372_s14 }
  0x34   :  { %1543 = vrot.lane.b32.xlu0 %v3498_v13, %s3372_s14 }
  0x36   :  { %1857 = vrot.lane.b32.xlu1 %v3498_v13, %s3373_s17 }
  0x38   :  { %1541 = vrot.lane.b32.xlu0 %v3486_v11, %s3372_s14 }
  0x3a   :  { %1855 = vrot.lane.b32.xlu1 %v3486_v11, %s3373_s17 }
  0x3c   :  { %1859 = vrot.lane.b32.xlu0 %v3117_v14, %s3373_s17 }
  0x3e   :  { %2026 = vrot.lane.b32.xlu1 %v3125_v15, %s3376_s22 }
  0x40   :  { %2024 = vrot.lane.b32.xlu0 %v3498_v13, %s3376_s22 }
  0x42   :  { %2191 = vrot.lane.b32.xlu1 %v3498_v13, %s3377_s23 }
  0x44   :  { %2022 = vrot.lane.b32.xlu0 %v3486_v11, %s3376_s22 }
  0x46   :  { %2189 = vrot.lane.b32.xlu1 %v3486_v11, %s3377_s23 }
  0x48   :  { %2193 = vrot.lane.b32.xlu0 %v3133_v16, %s3377_s23 }
  0x4a   :  { %2360 = vrot.lane.b32.xlu1 %v3141_v17, %s3378_s28 }
  0x4c   :  { %2358 = vrot.lane.b32.xlu0 %v3498_v13, %s3378_s28 }
  0x4e   :  { %2525 = vrot.lane.b32.xlu1 %v3498_v13, %s3379_s29 }
  0x50   :  { %2356 = vrot.lane.b32.xlu0 %v3486_v11, %s3378_s28 }
  0x52   :  { %2523 = vrot.lane.b32.xlu1 %v3486_v11, %s3379_s29 }
  0x54   :  { %2527 = vrot.lane.b32.xlu0 %v3149_v18, %s3379_s29 }
  0x56   :  { %2694 = vrot.lane.b32.xlu1 %v3157_v19, %s3380_s7 }
  0x58   :  { %2692 = vrot.lane.b32.xlu0 %v3498_v13, %s3380_s7 }
  0x5a   :  { %2859 = vrot.lane.b32.xlu1 %v3498_v13, %s3381_s8 }
  0x5c   :  { %2690 = vrot.lane.b32.xlu0 %v3486_v11, %s3380_s7 }
  0x5e   :  { %2857 = vrot.lane.b32.xlu1 %v3486_v11, %s3381_s8 }
  0x60   :  { %2861 = vrot.lane.b32.xlu0 %v3165_v20, %s3381_s8 }
  0x62   :  { %3021 = vperm.xlu1 %3345, %v1517_v34  }
  0x64   :  { %1520 = vperm.xlu0 %3344, %v1517_v34  }
  0x74   :  { %v24_v21 = vpop.permute.xlu1 %23 }
  0x76   :  { %v26_v22 = vpop.permute.xlu0 %25 }
  0x77   :  { %v30_v27 = vsel %vm29_vm2, %v24_v21, %v26_v22 }
  0x78   :  { %v344_v23 = vpop.permute.xlu1 %343 }
  0x7a   :  { %v28_v24 = vpop.permute.xlu0 %27 }
  0x7b   :  { %3209 = vmatpush3.msk.msra.mxu1 %vm36_vm1, %v28_v24  ;;  %v31_v25 = vsel %vm29_vm2, %v26_v22, %v28_v24 }
  0x7c   :  { %3051 = vmatprep.subr.msk.mxu0 %vm36_vm1, %v31_v25  ;;  %v342_v28 = vpop.permute.xlu1 %341  ;;  %3211 = vmatmul.mubr.msk.f32.vlgmr.msra.gmra.mrb[0].mxu1 %vm32_vm3, %v3567_v26 }
  0x7d   :  { %3052 = vmatpush1.msk.msra.mxu0 %vm36_vm1, %v30_v27  ;;  %3213 = vmatprep.subr.mxu1 %v3374_v3  ;;  %v348_v35 = vsel %vm347_vm4, %v342_v28, %v344_v23 }
  0x7e   :  { %3053 = vmatmul.mubr.msk.f32.vlgmr.msra.gmra.mrb[0].mxu0 %vm32_vm3, %v3567_v26  ;;  %3056 = vmatprep.subr.msk.mxu0 %vm36_vm1, %v3415_v1  ;;  %v346_v29 = vpop.permute.xlu0 %345  ;;  %v3698_v1 = vld [vmem:[%s3861_s1 + $0x40] sm:$0xff]  ;;  %s3383_s1 = smov [#allocation2]  }
  0x7f   :  { %3057 = vmatpush1.msk.msra.mxu0 %vm36_vm1, %v3409_v0  ;;  %v349_v30 = vsel %vm347_vm4, %v344_v23, %v346_v29  ;;  %3214 = vmatpush3.msk.msra.mxu1 %vm36_vm1, %v3422_v2  ;;  %s3039_s21 = sshll.u32 %s3383_s1, 4  ;;  %s3040_s21 = int_to_ptr.vmem [resolvable:$true] %s3039_s21 }
  0x80   :  { %3062 = vmatprep.subr.msk.mxu0 %vm36_vm1, %v349_v30  ;;  %3215 = vmatprep.mubr.msk.f32.mxu1 %vm3375_vm0, %v3374_v3  ;;  %v515_v31 = vpop.permute.xlu1 %514  ;;  %s3348_s24 = scalar_lea.vmem %s3040_s21, 768  ;;  %p3353_p1 = scmp.lt.s32.totalorder %s3040_s21, %s3040_s21 }
  0x81   :  { %3218 = vmatprep.subr.mxu1 %v3374_v3  ;;  %257 = vmatprep.mubr.f32.mxu0 %v3374_v3  ;;  %p3349_p0 = scmp.ne.s32.totalorder %s3040_s21, %s3348_s24  ;;  %p3354_p2 = scmp.lt.s32.totalorder %s3348_s24, %s3348_s24 }
  0x82   :  { %3216 = vmatmul.mubr.msk.f32.vlgmr.msra.gmra.mrb[2].mxu1 %vm32_vm3, %v3592_v32  ;;  %v513_v33 = vpop.permute.xlu0 %512 }
  0x83   :  { %3219 = vmatpush3.msk.msra.mxu1 %vm36_vm1, %v346_v29  ;;  %3220 = vmatprep.mubr.msk.f32.mxu1 %vm3375_vm0, %v3374_v3  ;;  %v518_v38 = vsel %vm516_vm5, %v513_v33, %v515_v31  ;;  %p3355_p3 = por %p3354_p2, %p3353_p1 }
  0x84   :  { %3223 = vmatprep.subr.mxu1 %v3374_v3  ;;  %v682_v36 = vpop.permute.xlu1 %681 }
  0x85   :  { %p3356_p4 = pnand %p3355_p3, %p3349_p0 }
  0x86   :  { %3058 = vmatmul.mubr.msk.f32.vlgmr.msra.gmra.mrb[0].mxu0 %vm32_vm3, %v3592_v32  ;;  %v511_v40 = vpop.permute.xlu0 %510  ;;  %3221 = vmatmul.mubr.msk.f32.vlgmr.msra.gmra.mrb[4].mxu1 %vm32_vm3, %v3608_v39 }
  0x87   :  { %3063 = vmatpush1.msk.msra.mxu0 %vm36_vm1, %v348_v35  ;;  %423 = vmatprep.mubr.f32.mxu0 %v3374_v3  ;;  %v517_v44 = vsel %vm516_vm5, %v511_v40, %v513_v33 }
  0x88   :  { %3068 = vmatprep.subr.msk.mxu0 %vm36_vm1, %v518_v38  ;;  %3224 = vmatpush3.msk.msra.mxu1 %vm36_vm1, %v515_v31  ;;  %v680_v41 = vpop.permute.xlu1 %679 }
  0x89   :  { %3225 = vmatprep.mubr.msk.f32.mxu1 %vm3375_vm0, %v3374_v3  ;;  %3228 = vmatprep.subr.mxu1 %v3374_v3  ;;  %v686_v52 = vsel %vm685_vm6, %v680_v41, %v682_v36 }
  0x8a   :  { %v684_v43 = vpop.permute.xlu0 %683  ;;  %3226 = vmatmul.mubr.msk.f32.vlgmr.msra.gmra.mrb[6].mxu1 %vm32_vm3, %v3624_v42 }
  0x8b   :  { %3229 = vmatpush3.msk.msra.mxu1 %vm36_vm1, %v684_v43  ;;  %3230 = vmatprep.mubr.msk.f32.mxu1 %vm3375_vm0, %v3374_v3  ;;  %v687_v46 = vsel %vm685_vm6, %v682_v36, %v684_v43 }
  0x8c   :  { %v853_v45 = vpop.permute.xlu1 %852  ;;  %3233 = vmatprep.subr.mxu1 %v3374_v3 }
  0x8e   :  { %3064 = vmatmul.mubr.msk.f32.vlgmr.msra.gmra.mrb[0].mxu0 %vm32_vm3, %v3608_v39  ;;  %v851_v48 = vpop.permute.xlu0 %850  ;;  %3231 = vmatmul.mubr.msk.f32.vlgmr.msra.gmra.mrb[8].mxu1 %vm32_vm3, %v3637_v47 }
  0x8f   :  { %3069 = vmatpush1.msk.msra.mxu0 %vm36_vm1, %v517_v44  ;;  %592 = vmatprep.mubr.f32.mxu0 %v3374_v3  ;;  %v856_v54 = vsel %vm854_vm7, %v851_v48, %v853_v45 }
  0x90   :  { %3074 = vmatprep.subr.msk.mxu0 %vm36_vm1, %v687_v46  ;;  %v1020_v49 = vpop.permute.xlu1 %1019  ;;  %3234 = vmatpush3.msk.msra.mxu1 %vm36_vm1, %v853_v45 }
  0x91   :  { %3235 = vmatprep.mubr.msk.f32.mxu1 %vm3375_vm0, %v3374_v3  ;;  %3238 = vmatprep.subr.mxu1 %v3374_v3 }
  0x92   :  { %v849_v51 = vpop.permute.xlu0 %848  ;;  %3236 = vmatmul.mubr.msk.f32.vlgmr.msra.gmra.mrb[10].mxu1 %vm32_vm3, %v3653_v50 }
  0x93   :  { %3240 = vmatprep.mubr.msk.f32.mxu1 %vm3375_vm0, %v3374_v3  ;;  %v855_v59 = vsel %vm854_vm7, %v849_v51, %v851_v48 }
  0x94   :  { %v1018_v53 = vpop.permute.xlu1 %1017 }
  0x95   :  { %v1024_v4 = vsel %vm1023_vm8, %v1018_v53, %v1020_v49 }
  0x96   :  { %3070 = vmatmul.mubr.msk.f32.vlgmr.msra.gmra.mrb[0].mxu0 %vm32_vm3, %v3624_v42  ;;  %v1022_v55 = vpop.permute.xlu0 %1021 }
  0x97   :  { %3075 = vmatpush1.msk.msra.mxu0 %vm36_vm1, %v686_v52  ;;  %761 = vmatprep.mubr.f32.mxu0 %v3374_v3  ;;  %v1025_v62 = vsel %vm1023_vm8, %v1020_v49, %v1022_v55 }
  0x98   :  { %3080 = vmatprep.subr.msk.mxu0 %vm36_vm1, %v856_v54  ;;  %3239 = vmatpush3.msk.msra.mxu1 %vm36_vm1, %v1022_v55  ;;  %v1191_v56 = vpop.permute.xlu1 %1190 }
  0x99   :  { %3243 = vmatprep.subr.mxu1 %v3374_v3  ;;  %3241 = vmatmul.mubr.msk.f32.vlgmr.msra.gmra.mrb[12].mxu1 %vm32_vm3, %v3670_v57 }
  0x9a   :  { %v1189_v58 = vpop.permute.xlu0 %1188  ;;  %3244 = vmatpush3.msk.msra.mxu1 %vm36_vm1, %v1191_v56  ;;  %3245 = vmatprep.mubr.msk.f32.mxu1 %vm3375_vm0, %v3374_v3 }
  0x9b   :  { %3248 = vmatprep.subr.mxu1 %v3374_v3  ;;  %v1194_v6 = vsel %vm1192_vm9, %v1189_v58, %v1191_v56 }
  0x9c   :  { %v1358_v60 = vpop.permute.xlu1 %1357 }
  0x9d   :  { %3246 = vmatmul.mubr.msk.f32.vlgmr.msra.gmra.mrb[14].mxu1 %vm32_vm3, %v3683_v61 }
  0x9e   :  { %3076 = vmatmul.mubr.msk.f32.vlgmr.msra.gmra.mrb[0].mxu0 %vm32_vm3, %v3637_v47  ;;  %v1187_v63 = vpop.permute.xlu0 %1186  ;;  %3250 = vmatprep.mubr.msk.f32.mxu1 %vm3375_vm0, %v3374_v3 }
  0x9f   :  { %3081 = vmatpush1.msk.msra.mxu0 %vm36_vm1, %v855_v59  ;;  %930 = vmatprep.mubr.f32.mxu0 %v3374_v3  ;;  %v1193_v10 = vsel %vm1192_vm9, %v1187_v63, %v1189_v58 }
  0xa0   :  { %3086 = vmatprep.subr.msk.mxu0 %vm36_vm1, %v1025_v62  ;;  %v1356_v0 = vpop.permute.xlu1 %1355 }
  0xa1   :  { %v1362_v18 = vsel %vm1361_vm10, %v1356_v0, %v1358_v60 }
  0xa2   :  { %v1360_v2 = vpop.permute.xlu0 %1359 }
  0xa3   :  { %3249 = vmatpush3.msk.msra.mxu1 %vm36_vm1, %v1360_v2  ;;  %v1363_v15 = vsel %vm1361_vm10, %v1358_v60, %v1360_v2 }
  0xa4   :  { %v1546_v5 = vpop.permute.xlu1 %1545  ;;  %3253 = vmatprep.subr.mxu1 %v3374_v3  ;;  %3251 = vmatmul.mubr.msk.f32.vlgmr.msra.gmra.mrb[16].mxu1 %vm32_vm3, %v3698_v1 }
  0xa5   :  { %3254 = vmatpush3.msk.msra.mxu1 %vm36_vm1, %v1546_v5  ;;  %3255 = vmatprep.mubr.msk.f32.mxu1 %vm3375_vm0, %v3374_v3 }
  0xa6   :  { %3082 = vmatmul.mubr.msk.f32.vlgmr.msra.gmra.mrb[0].mxu0 %vm32_vm3, %v3653_v50  ;;  %v1544_v7 = vpop.permute.xlu0 %1543  ;;  %3258 = vmatprep.subr.mxu1 %v3374_v3 }
  0xa7   :  { %3087 = vmatpush1.msk.msra.mxu0 %vm36_vm1, %v1024_v4  ;;  %1099 = vmatprep.mubr.f32.mxu0 %v3374_v3  ;;  %v1548_v20 = vsel %vm29_vm2, %v1544_v7, %v1546_v5 }
  0xa8   :  { %3092 = vmatprep.subr.msk.mxu0 %vm36_vm1, %v1194_v6  ;;  %v3715_v8 = vpop.permute.xlu1 %1857  ;;  %3256 = vmatmul.mubr.msk.f32.vlgmr.msra.gmra.mrb[18].mxu1 %vm32_vm3, %v3567_v26 }
  0xa9   :  { %3259 = vmatpush3.msk.msra.mxu1 %vm36_vm1, %v3493_v12  ;;  %3260 = vmatprep.mubr.msk.f32.mxu1 %vm3375_vm0, %v3374_v3 }
  0xaa   :  { %v1542_v9 = vpop.permute.xlu0 %1541  ;;  %3263 = vmatprep.subr.mxu1 %v3374_v3 }
  0xab   :  { %v1547_v24 = vsel %vm29_vm2, %v1542_v9, %v1544_v7 }
  0xac   :  { %v1856_v14 = vpop.permute.xlu1 %1855  ;;  %3261 = vmatmul.mubr.msk.f32.vlgmr.msra.gmra.mrb[20].mxu1 %vm32_vm3, %v3592_v32 }
  0xad   :  { %3265 = vmatprep.mubr.msk.f32.mxu1 %vm3375_vm0, %v3374_v3  ;;  %v1861_v33 = vsel %vm347_vm4, %v1856_v14, %v3715_v8 }
  0xae   :  { %3088 = vmatmul.mubr.msk.f32.vlgmr.msra.gmra.mrb[0].mxu0 %vm32_vm3, %v3670_v57  ;;  %v1860_v12 = vpop.permute.xlu0 %1859 }
  0xaf   :  { %3093 = vmatpush1.msk.msra.mxu0 %vm36_vm1, %v1193_v10  ;;  %1268 = vmatprep.mubr.f32.mxu0 %v3374_v3  ;;  %v1862_v29 = vsel %vm347_vm4, %v3715_v8, %v1860_v12 }
  0xb0   :  { %3098 = vmatprep.subr.msk.mxu0 %vm36_vm1, %v1363_v15  ;;  %3264 = vmatpush3.msk.msra.mxu1 %vm36_vm1, %v1860_v12  ;;  %v2027_v16 = vpop.permute.xlu1 %2026 }
  0xb1   :  { %3268 = vmatprep.subr.mxu1 %v3374_v3  ;;  %3266 = vmatmul.mubr.msk.f32.vlgmr.msra.gmra.mrb[22].mxu1 %vm32_vm3, %v3608_v39 }
  0xb2   :  { %v2025_v17 = vpop.permute.xlu0 %2024  ;;  %3269 = vmatpush3.msk.msra.mxu1 %vm36_vm1, %v2027_v16  ;;  %3270 = vmatprep.mubr.msk.f32.mxu1 %vm3375_vm0, %v3374_v3 }
  0xb3   :  { %3273 = vmatprep.subr.mxu1 %v3374_v3 }
  0xb4   :  { %v2192_v19 = vpop.permute.xlu1 %2191 }
  0xb5   :  { %3271 = vmatmul.mubr.msk.f32.vlgmr.msra.gmra.mrb[24].mxu1 %vm32_vm3, %v3624_v42 }
  0xb6   :  { %3094 = vmatmul.mubr.msk.f32.vlgmr.msra.gmra.mrb[0].mxu0 %vm32_vm3, %v3683_v61  ;;  %v2023_v21 = vpop.permute.xlu0 %2022  ;;  %3275 = vmatprep.mubr.msk.f32.mxu1 %vm3375_vm0, %v3374_v3 }
  0xb7   :  { %3099 = vmatpush1.msk.msra.mxu0 %vm36_vm1, %v1362_v18  ;;  %1437 = vmatprep.mubr.f32.mxu0 %v3374_v3  ;;  %v2028_v36 = vsel %vm516_vm5, %v2023_v21, %v2025_v17 }
  0xb8   :  { %3106 = vmatprep.subr.msk.mxu0 %vm36_vm1, %v1548_v20  ;;  %v2190_v22 = vpop.permute.xlu1 %2189 }
  0xb9   :  { %v2195_v38 = vsel %vm685_vm6, %v2190_v22, %v2192_v19 }
  0xba   :  { %v2194_v23 = vpop.permute.xlu0 %2193 }
  0xbb   :  { %3274 = vmatpush3.msk.msra.mxu1 %vm36_vm1, %v2194_v23 }
  0xbc   :  { %v2361_v25 = vpop.permute.xlu1 %2360  ;;  %3276 = vmatmul.mubr.msk.f32.vlgmr.msra.gmra.mrb[26].mxu1 %vm32_vm3, %v3637_v47  ;;  %3278 = vmatprep.subr.mxu1 %v3374_v3 }
  0xbd   :  { %3279 = vmatpush3.msk.msra.mxu1 %vm36_vm1, %v2361_v25  ;;  %3280 = vmatprep.mubr.msk.f32.mxu1 %vm3375_vm0, %v3374_v3 }
  0xbe   :  { %3100 = vmatmul.mubr.msk.f32.vlgmr.msra.gmra.mrb[0].mxu0 %vm32_vm3, %v3698_v1  ;;  %v2359_v27 = vpop.permute.xlu0 %2358  ;;  %3283 = vmatprep.subr.mxu1 %v3374_v3 }
  0xbf   :  { %3107 = vmatpush1.msk.msra.mxu0 %vm36_vm1, %v1547_v24  ;;  %1622 = vmatprep.mubr.f32.mxu0 %v3374_v3  ;;  %v2363_v40 = vsel %vm854_vm7, %v2359_v27, %v2361_v25 }
  0xc0   :  { %3111 = vmatprep.subr.msk.mxu0 %vm36_vm1, %v3498_v13  ;;  %v2526_v28 = vpop.permute.xlu1 %2525  ;;  %3281 = vmatmul.mubr.msk.f32.vlgmr.msra.gmra.mrb[28].mxu1 %vm32_vm3, %v3653_v50 }
  0xc1   :  { %3285 = vmatprep.mubr.msk.f32.mxu1 %vm3375_vm0, %v3374_v3 }
  0xc2   :  { %3108 = vmatmul.mubr.msk.f32.vlgmr.msra.gmra.mrb[2].mxu0 %vm32_vm3, %v3567_v26  ;;  %v2357_v30 = vpop.permute.xlu0 %2356  ;;  %v2029_v26 = vsel %vm516_vm5, %v2025_v17, %v2027_v16 }
  0xc3   :  { %3112 = vmatpush1.msk.msra.mxu0 %vm36_vm1, %v3486_v11  ;;  %1772 = vmatprep.mubr.f32.mxu0 %v3374_v3 }
  0xc4   :  { %3119 = vmatprep.subr.msk.mxu0 %vm36_vm1, %v1862_v29  ;;  %v2524_v13 = vpop.permute.xlu1 %2523 }
  0xc6   :  { %v2528_v31 = vpop.permute.xlu0 %2527 }
  0xc7   :  { %3284 = vmatpush3.msk.msra.mxu1 %vm36_vm1, %v2528_v31  ;;  %v2530_v41 = vsel %vm1023_vm8, %v2526_v28, %v2528_v31 }
  0xc8   :  { %3286 = vmatmul.mubr.msk.f32.vlgmr.msra.gmra.mrb[30].mxu1 %vm32_vm3, %v3670_v57  ;;  %v2695_v34 = vpop.permute.xlu1 %2694  ;;  %3288 = vmatprep.subr.mxu1 %v3374_v3 }
  0xc9   :  { %3289 = vmatpush3.msk.msra.mxu1 %vm36_vm1, %v2695_v34  ;;  %3290 = vmatprep.mubr.msk.f32.mxu1 %vm3375_vm0, %v3374_v3 }
  0xca   :  { %3113 = vmatmul.mubr.msk.f32.vlgmr.msra.gmra.mrb[2].mxu0 %vm32_vm3, %v3592_v32  ;;  %v2693_v11 = vpop.permute.xlu0 %2692  ;;  %3293 = vmatprep.subr.mxu1 %v3374_v3  ;;  %v2196_v32 = vsel %vm685_vm6, %v2192_v19, %v2194_v23 }
  0xcb   :  { %3120 = vmatpush1.msk.msra.mxu0 %vm36_vm1, %v1861_v33  ;;  %1936 = vmatprep.mubr.f32.mxu0 %v3374_v3  ;;  %v2697_v43 = vsel %vm1192_vm9, %v2693_v11, %v2695_v34 }
  0xcc   :  { %3127 = vmatprep.subr.msk.mxu0 %vm36_vm1, %v2029_v26  ;;  %3291 = vmatmul.mubr.msk.f32.vlgmr.msra.gmra.mrb[32].mxu1 %vm32_vm3, %v3683_v61  ;;  %v2860_v44 = vpop.permute.xlu1 %2859 }
  0xcd   :  { %3295 = vmatprep.mubr.msk.f32.mxu1 %vm3375_vm0, %v3374_v3 }
  0xce   :  { %v2691_v35 = vpop.permute.xlu0 %2690 }
  0xcf   :  { %v2696_v45 = vsel %vm1192_vm9, %v2691_v35, %v2693_v11 }
  0xd2   :  { %3121 = vmatmul.mubr.msk.f32.vlgmr.msra.gmra.mrb[2].mxu0 %vm32_vm3, %v3608_v39  ;;  %v2862_v37 = vpop.permute.xlu0 %2861  ;;  %v2362_v39 = vsel %vm854_vm7, %v2357_v30, %v2359_v27 }
  0xd3   :  { %3128 = vmatpush1.msk.msra.mxu0 %vm36_vm1, %v2028_v36  ;;  %2103 = vmatprep.mubr.f32.mxu0 %v3374_v3  ;;  %v2864_v46 = vsel %vm1361_vm10, %v2860_v44, %v2862_v37 }
  0xd4   :  { %3135 = vmatprep.subr.msk.mxu0 %vm36_vm1, %v2196_v32  ;;  %3294 = vmatpush3.msk.msra.mxu1 %vm36_vm1, %v2862_v37 }
  0xd5   :  { %3296 = vmatmul.mubr.msk.f32.vlgmr.msra.gmra.mrb[34].mxu1 %vm32_vm3, %v3698_v1 }
  0xda   :  { %3129 = vmatmul.mubr.msk.f32.vlgmr.msra.gmra.mrb[2].mxu0 %vm32_vm3, %v3624_v42  ;;  %v2529_v42 = vsel %vm1023_vm8, %v2524_v13, %v2526_v28 }
  0xdb   :  { %3136 = vmatpush1.msk.msra.mxu0 %vm36_vm1, %v2195_v38  ;;  %2270 = vmatprep.mubr.f32.mxu0 %v3374_v3 }
  0xdc   :  { %3143 = vmatprep.subr.msk.mxu0 %vm36_vm1, %v2363_v40 }
  0xe2   :  { %3137 = vmatmul.mubr.msk.f32.vlgmr.msra.gmra.mrb[2].mxu0 %vm32_vm3, %v3637_v47  ;;  %v2858_v47 = vpop.permute.xlu1 %2857 }
  0xe3   :  { %3144 = vmatpush1.msk.msra.mxu0 %vm36_vm1, %v2362_v39  ;;  %2437 = vmatprep.mubr.f32.mxu0 %v3374_v3  ;;  %v2863_v48 = vsel %vm1361_vm10, %v2858_v47, %v2860_v44  ;;  %v1521_v14 = vpop.permute.xlu0 %1520 }
  0xe4   :  { %3151 = vmatprep.subr.msk.mxu0 %vm36_vm1, %v2530_v41 }
  0xe6   :  { %v3022_v44 = vpop.permute.xlu1 %3021 }
  0xea   :  { %3145 = vmatmul.mubr.msk.f32.vlgmr.msra.gmra.mrb[2].mxu0 %vm32_vm3, %v3653_v50 }
  0xeb   :  { %3152 = vmatpush1.msk.msra.mxu0 %vm36_vm1, %v2529_v42  ;;  %2604 = vmatprep.mubr.f32.mxu0 %v3374_v3 }
  0xec   :  { %3159 = vmatprep.subr.msk.mxu0 %vm36_vm1, %v2697_v43 }
  0xf2   :  { %3153 = vmatmul.mubr.msk.f32.vlgmr.msra.gmra.mrb[2].mxu0 %vm32_vm3, %v3670_v57 }
  0xf3   :  { %3160 = vmatpush1.msk.msra.mxu0 %vm36_vm1, %v2696_v45  ;;  %2771 = vmatprep.mubr.f32.mxu0 %v3374_v3 }
  0xf4   :  { %3167 = vmatprep.subr.msk.mxu0 %vm36_vm1, %v2864_v46 }
  0xfa   :  { %3161 = vmatmul.mubr.msk.f32.vlgmr.msra.gmra.mrb[2].mxu0 %vm32_vm3, %v3683_v61 }
  0xfb   :  { %3168 = vmatpush1.msk.msra.mxu0 %vm36_vm1, %v2863_v48  ;;  %2938 = vmatprep.mubr.f32.mxu0 %v3374_v3 }
 0x102   :  { %3169 = vmatmul.mubr.msk.f32.vlgmr.msra.gmra.mrb[2].mxu0 %vm32_vm3, %v3698_v1 }
 0x14f   :  { %v180_v49 = vpop.f32.mrb[0].mxu1 }
 0x150   :  { %v3212_v50 = vpop.f32.mrb[1].mxu1 }
 0x155   :  { %v330_v51 = vpop.f32.mrb[2].mxu1 }
 0x156   :  { %v331_v52 = vadd.f32 %v330_v51, %v180_v49  ;;  %v3217_v53 = vpop.f32.mrb[3].mxu1 }
 0x159   :  { %v496_v54 = vpop.f32.mrb[4].mxu1 }
 0x15a   :  { %v502_v55 = vadd.f32 %v496_v54, %v331_v52  ;;  %v3222_v56 = vpop.f32.mrb[5].mxu1 }
 0x15d   :  { %v665_v57 = vpop.f32.mrb[6].mxu1 }
 0x15e   :  { %v671_v58 = vadd.f32 %v665_v57, %v502_v55  ;;  %v3227_v59 = vpop.f32.mrb[7].mxu1 }
 0x161   :  { %v834_v60 = vpop.f32.mrb[8].mxu1 }
 0x162   :  { %v840_v61 = vadd.f32 %v834_v60, %v671_v58  ;;  %v3232_v62 = vpop.f32.mrb[9].mxu1 }
 0x165   :  { %v1003_v63 = vpop.f32.mrb[10].mxu1 }
 0x166   :  { %v1009_v0 = vadd.f32 %v1003_v63, %v840_v61  ;;  %v3237_v3 = vpop.f32.mrb[11].mxu1 }
 0x16c   :  { %v1172_v2 = vpop.f32.mrb[12].mxu1 }
 0x16d   :  { %v1178_v4 = vadd.f32 %v1172_v2, %v1009_v0  ;;  %v3242_v1 = vpop.f32.mrb[13].mxu1 }
 0x170   :  { %v1341_v5 = vpop.f32.mrb[14].mxu1 }
 0x171   :  { %v1347_v6 = vadd.f32 %v1341_v5, %v1178_v4  ;;  %v3247_v7 = vpop.f32.mrb[15].mxu1 }
 0x177   :  { %v1510_v8 = vpop.f32.mrb[16].mxu1 }
 0x178   :  { %v1516_v9 = vadd.f32 %v1510_v8, %v1347_v6  ;;  %v3252_v10 = vpop.f32.mrb[17].mxu1 }
 0x17a   :  { %v1525_v15 = vadd.f32 %v1521_v14, %v1516_v9 }
 0x17b   :  { %v1695_v12 = vpop.f32.mrb[18].mxu1 }
 0x17c   :  { %v1528_v16 = vmax.f32 %v1525_v15, 0.0  ;;  %v3257_v17 = vpop.f32.mrb[19].mxu1 }
 0x17e   :  { %1532 = vst.msk [vmem:[#allocation2 + $0x10] sm:$0xff] %vm1531_vm11, %v1528_v16 }
 0x17f   :  { %v1845_v18 = vpop.f32.mrb[20].mxu1 }
 0x180   :  { %v1846_v19 = vadd.f32 %v1845_v18, %v1695_v12  ;;  %v3262_v20 = vpop.f32.mrb[21].mxu1 }
 0x184   :  { %v2009_v21 = vpop.f32.mrb[22].mxu1 }
 0x185   :  { %v2015_v22 = vadd.f32 %v2009_v21, %v1846_v19  ;;  %v3267_v23 = vpop.f32.mrb[23].mxu1 }
 0x188   :  { %v2176_v24 = vpop.f32.mrb[24].mxu1 }
 0x189   :  { %v2182_v25 = vadd.f32 %v2176_v24, %v2015_v22  ;;  %v3272_v27 = vpop.f32.mrb[25].mxu1 }
 0x18f   :  { %v2343_v28 = vpop.f32.mrb[26].mxu1 }
 0x190   :  { %v2349_v29 = vadd.f32 %v2343_v28, %v2182_v25  ;;  %v3277_v30 = vpop.f32.mrb[27].mxu1 }
 0x191   :  { %v1439_v13 = vpop.f32.mrb[0].mxu0 }
 0x192   :  { %v1523_v31 = vadd.f32 %v1521_v14, %v1439_v13  ;;  %v1441_v33 = vpop.f32.mrb[1].mxu0 }
 0x193   :  { %v1524_v34 = vadd.f32 %v1521_v14, %v1441_v33  ;;  %v2510_v26 = vpop.f32.mrb[28].mxu1 }
 0x194   :  { %v1526_v11 = vmax.f32 %v1523_v31, 0.0  ;;  %v2516_v35 = vadd.f32 %v2510_v26, %v2349_v29  ;;  %v3282_v36 = vpop.f32.mrb[29].mxu1 }
 0x195   :  { %v1527_v32 = vmax.f32 %v1524_v34, 0.0 }
 0x196   :  { %1529 = vst [vmem:[#allocation2] sm:$0xff] %v1526_v11 }
 0x197   :  { %1530 = vst [vmem:[#allocation2 + $0x8] sm:$0xff] %v1527_v32 }
 0x19b   :  { %v2677_v37 = vpop.f32.mrb[30].mxu1 }
 0x19c   :  { %v2683_v38 = vadd.f32 %v2677_v37, %v2516_v35  ;;  %v3287_v40 = vpop.f32.mrb[31].mxu1 }
 0x19f   :  { %v2844_v39 = vpop.f32.mrb[32].mxu1 }
 0x1a0   :  { %v2850_v41 = vadd.f32 %v2844_v39, %v2683_v38  ;;  %v3292_v42 = vpop.f32.mrb[33].mxu1 }
 0x1a8   :  { %v3011_v43 = vpop.f32.mrb[34].mxu1 }
 0x1a9   :  { %v3017_v45 = vadd.f32 %v3011_v43, %v2850_v41  ;;  %v3297_v46 = vpop.f32.mrb[35].mxu1 }
 0x1ab   :  { %v3026_v47 = vadd.f32 %v3022_v44, %v3017_v45 }
 0x1ad   :  { %v3029_v48 = vmax.f32 %v3026_v47, 0.0 }
 0x1af   :  { %3033 = vst.msk [vmem:[#allocation2 + $0x28] sm:$0xff] %vm1531_vm11, %v3029_v48 }
 0x1d5   :  { %v2940_v49 = vpop.f32.mrb[2].mxu0 }
 0x1d6   :  { %v3024_v50 = vadd.f32 %v3022_v44, %v2940_v49  ;;  %v2942_v51 = vpop.f32.mrb[3].mxu0 }
 0x1d7   :  { %v3025_v52 = vadd.f32 %v3022_v44, %v2942_v51 }
 0x1d8   :  { %v3027_v53 = vmax.f32 %v3024_v50, 0.0 }
 0x1d9   :  { %v3028_v54 = vmax.f32 %v3025_v52, 0.0 }
 0x1da   :  { %3031 = vst [vmem:[#allocation2 + $0x18] sm:$0xff] %v3027_v53 }
 0x1db   :  { %3032 = vst [vmem:[#allocation2 + $0x20] sm:$0xff] %v3028_v54 }
 0x1dc   :  { %3359 = shalt.err (!%p3356_p4)
}
 0x1dd   :  { %s3360_s25 = scalar_lea.hbm %s3863_s3, 768 }
 0x1de   :  { %p3361_p5 = scmp.ne.s32.totalorder %s3863_s3, %s3360_s25  ;;  %p3364_p6 = scmp.lt.u32.totalorder %s3360_s25, %s3863_s3 }
 0x1e0   :  { %p3366_p7 = pnand %p3364_p6, %p3361_p5 }
 0x1e2   :  { %3369 = shalt.err (!%p3366_p7)
}
 0x1e3   :  { %s3384_s29 = smov 384   ;;  %s3385_s30 = smov 24  }
 0x1e4   :  { %3045 = dma.vmem_to_hbm [thread:$0]  %s3040_s21, 768, %s3863_s3, [#allocation3], %s3384_s29, %s3384_s29, %s3385_s30  }
 0x1e5   :  { %3370 = dma.done.wait [#allocation3], 768  }
 0x1e6   :  { %3371 = vsyncadd [#allocation3], 4294966528 }
 0x1e7   :  { %3049 = vsyncpa [#allocation3], 1 }

</bundles_post_ra>
